<compile_context>
chip_gen: v5e
topology: v5e:2x2
jax: 0.10.0
libtpu: 0.0.40
codegen_flags: <defaults>
</compile_context>

<pallas_src>
import jax
import jax.numpy as jnp
from jax.experimental import pallas as pl
from jax.experimental.pallas import tpu as pltpu


def _round_up(n, m):
    return -(-n // m) * m


def _mlp_kernel(x_ref, w1_ref, b1_ref, w2_ref, w3_ref, o_ref):
    # x: (TILE_B, nX) f32.  Transpose first (f32, rides the XLU) so batch sits
    # on the lane axis, then cast to bf16 on the dense (nX, TILE_B) layout.
    xt = x_ref[...].T.astype(jnp.bfloat16)                       # (nX, TILE_B)
    z1 = jnp.dot(w1_ref[...], xt, preferred_element_type=jnp.float32)
    # bf16 elementwise: cast, add layer-1 bias, ReLU.  Row 50 of h1 becomes the
    # constant 1 that carries the folded layer-2/3 biases; rows 51..55 are 0.
    h1 = jnp.maximum(z1.astype(jnp.bfloat16) + b1_ref[...], 0)   # (56, TILE_B)
    z2 = jnp.dot(w2_ref[...], h1, preferred_element_type=jnp.float32)
    h2 = jnp.maximum(z2.astype(jnp.bfloat16), 0)                 # (32, TILE_B), row 25 == 1
    out = jnp.dot(w3_ref[...], h2, preferred_element_type=jnp.float32)
    o_ref[...] = out                                             # (1, TILE_B) lane-dense f32


def _prepare_params(params):
    """One-time prep of the tiny weights: fold b2/b3 into the matmuls via a
    constant 'ones' row and zero-pad hidden dims to sublane multiples."""
    w1, b1, w2, b2, w3, b3 = params                  # w: (out, in) f32, b: (out,) f32
    h1, h2 = w1.shape[0], w2.shape[0]                # 50, 25
    nx = w1.shape[1]
    h1p = _round_up(h1 + 1, 8)                       # 56 = 50 outputs + ones row + pad
    h2p = _round_up(h2 + 1, 8)                       # 32 = 25 outputs + ones row + pad

    w1a = jnp.zeros((h1p, nx), jnp.float32).at[:h1].set(w1)
    b1a = (jnp.zeros((h1p, 1), jnp.float32)
           .at[:h1, 0].set(b1)
           .at[h1, 0].set(1.0))                      # ones row: relu(0 + 1) == 1
    w2a = (jnp.zeros((h2p, h1p), jnp.float32)
           .at[:h2, :h1].set(w2)
           .at[:h2, h1].set(b2)                      # b2 rides the ones row
           .at[h2, h1].set(1.0))                     # keep the ones row alive
    w3a = (jnp.zeros((1, h2p), jnp.float32)
           .at[0, :h2].set(w3[0])
           .at[0, h2].set(b3[0]))                    # b3 rides the ones row
    bf = lambda a: a.astype(jnp.bfloat16)
    return bf(w1a), bf(b1a), bf(w2a), bf(w3a)


def _is_multicore_tensorcore_chip():
    """True on v7x-class chips (2 TensorCores); safe fallback elsewhere."""
    try:
        kind = jax.devices()[0].device_kind.lower()
    except Exception:
        return False
    return any(tag in kind for tag in ("v7", "7x"))


def pytorch_mlp_forward(x, params, *, tile_b=16384):
    """Forward pass of PytorchMLP. x: (batch, nX) f32. Returns (batch,) f32."""
    batch, nX = x.shape
    w1a, b1a, w2a, w3a = _prepare_params(params)

    # Batch tile must be a multiple of 128 lanes (lane-dense (1, tile_b) output
    # block); don't make it larger than one grid step needs.
    tile_b = _round_up(max(1, min(tile_b, batch)), 128)
    num_tiles = pl.cdiv(batch, tile_b)
    # Output is allocated at a tile multiple so output blocks always divide it.
    # The ragged tail of the *input* read is handled by Pallas (values read
    # past `batch` are unspecified but only feed lanes sliced off below).
    out_cols = num_tiles * tile_b

    # VMEM budget: x double-buffer (lane-padded to 128), f32/bf16 intermediates,
    # plus headroom; clamp to v7x's 64 MiB physical VMEM.
    vmem_bytes = 2 * tile_b * _round_up(nX, 128) * 4 + tile_b * 1024 + (8 << 20)
    vmem_bytes = int(min(max(vmem_bytes, 32 << 20), 64 << 20))

    if _is_multicore_tensorcore_chip() and num_tiles > 1:
        dims = (pltpu.CORE_PARALLEL,)     # shard batch tiles across both TCs (v7x)
    else:
        dims = ("parallel",)              # portable; no-op on 1-TC chips

    resident = lambda i: (0, 0)           # constant index_map -> weights stay in VMEM
    out = pl.pallas_call(
        _mlp_kernel,
        grid=(num_tiles,),
        out_shape=jax.ShapeDtypeStruct((1, out_cols), jnp.float32),
        in_specs=[
            # On v5e, if a trace shows exposed DMA, add pipeline_mode=pl.Buffered(3).
            pl.BlockSpec((tile_b, nX), lambda i: (i, 0)),      # x tile, double-buffered
            pl.BlockSpec(w1a.shape, resident),
            pl.BlockSpec(b1a.shape, resident),
            pl.BlockSpec(w2a.shape, resident),
            pl.BlockSpec(w3a.shape, resident),
        ],
        out_specs=pl.BlockSpec((1, tile_b), lambda i: (0, i)),
        compiler_params=pltpu.CompilerParams(
            dimension_semantics=dims,
            vmem_limit_bytes=vmem_bytes,
        ),
    )(x, w1a, b1a, w2a, w3a)

    # .flatten() in the PyTorch forward; drop any ragged-tile tail.
    return out[0, :batch]


def init_params(key, nX):
    """PyTorch nn.Linear default init: U(-1/sqrt(fan_in), +1/sqrt(fan_in)).
    Weights stored (out, in) like PyTorch; biases stored (out,)."""
    def linear(k, fan_in, fan_out):
        kw, kb = jax.random.split(k)
        bound = 1.0 / jnp.sqrt(jnp.float32(fan_in))
        w = jax.random.uniform(kw, (fan_out, fan_in), jnp.float32, -bound, bound)
        b = jax.random.uniform(kb, (fan_out,), jnp.float32, -bound, bound)
        return w, b

    k1, k2, k3 = jax.random.split(key, 3)
    w1, b1 = linear(k1, nX, 50)
    w2, b2 = linear(k2, 50, 25)
    w3, b3 = linear(k3, 25, 1)
    return (w1, b1, w2, b2, w3, b3)


def _reference_f32(x, params):
    w1, b1, w2, b2, w3, b3 = params
    h1 = jnp.maximum(x @ w1.T + b1, 0.0)
    h2 = jnp.maximum(h1 @ w2.T + b2, 0.0)
    return (h2 @ w3.T + b3).reshape(-1)


def _reference_bf16(x, params):
    """Mirrors the kernel's exact mixed precision (bf16 operands / elementwise,
    f32 accumulation, layer-2/3 biases folded into the matmuls)."""
    w1a, b1a, w2a, w3a = _prepare_params(params)
    xt = x.T.astype(jnp.bfloat16)
    z1 = jnp.dot(w1a, xt, preferred_element_type=jnp.float32)
    h1 = jnp.maximum(z1.astype(jnp.bfloat16) + b1a, 0)
    z2 = jnp.dot(w2a, h1, preferred_element_type=jnp.float32)
    h2 = jnp.maximum(z2.astype(jnp.bfloat16), 0)
    return jnp.dot(w3a, h2, preferred_element_type=jnp.float32)[0]


if __name__ == "__main__":
    key = jax.random.PRNGKey(0)
    k_x1, k_x2, k_p = jax.random.split(key, 3)

    nX = 16
    params = init_params(k_p, nX)

    # Small single-tile case (batch rounds up to one 128-lane tile).
    batch1 = 8
    x1 = jax.random.normal(k_x1, (batch1, nX), jnp.float32)
    out1 = pytorch_mlp_forward(x1, params)
    jax.block_until_ready(out1)
    assert out1.shape == (batch1,)
    assert jnp.allclose(out1, _reference_bf16(x1, params), atol=2e-3, rtol=2e-3)
    assert jnp.allclose(out1, _reference_f32(x1, params), atol=1e-1, rtol=1e-1)

    # Multi-tile grid with a ragged last input tile (300 = 256 + 44).
    batch2 = 300
    x2 = jax.random.normal(k_x2, (batch2, nX), jnp.float32)
    out2 = pytorch_mlp_forward(x2, params, tile_b=256)
    jax.block_until_ready(out2)
    assert out2.shape == (batch2,)
    assert jnp.allclose(out2, _reference_bf16(x2, params), atol=2e-3, rtol=2e-3)
    assert jnp.allclose(out2, _reference_f32(x2, params), atol=1e-1, rtol=1e-1)

    print("KERNEL_OK")
</pallas_src>

<mosaic_0001>
module attributes {stable_mosaic.version = 11 : i64} {
  func.func @_mlp_kernel(%arg0: i32, %arg1: memref<128x16xf32, #tpu.memory_space<vmem>>, %arg2: memref<56x16xbf16, #tpu.memory_space<vmem>>, %arg3: memref<56x1xbf16, #tpu.memory_space<vmem>>, %arg4: memref<32x56xbf16, #tpu.memory_space<vmem>>, %arg5: memref<1x32xbf16, #tpu.memory_space<vmem>>, %arg6: memref<1x128xf32, #tpu.memory_space<vmem>>) attributes {dimension_semantics = [#tpu.dimension_semantics<parallel>], iteration_bounds = array<i64: 1>, scalar_prefetch = 0 : i64, scratch_operands = 0 : i64, tpu.core_type = #tpu.core_type<tc>, window_params = [{transform_indices = @transform_0, window_bounds = array<i64: 128, 16>}, {pipeline_mode = #tpu.pipeline_mode<synchronous>, transform_indices = @transform_1, window_bounds = array<i64: 56, 16>}, {pipeline_mode = #tpu.pipeline_mode<synchronous>, transform_indices = @transform_2, window_bounds = array<i64: 56, 1>}, {pipeline_mode = #tpu.pipeline_mode<synchronous>, transform_indices = @transform_3, window_bounds = array<i64: 32, 56>}, {pipeline_mode = #tpu.pipeline_mode<synchronous>, transform_indices = @transform_4, window_bounds = array<i64: 1, 32>}, {transform_indices = @transform_5, window_bounds = array<i64: 1, 128>}]} {
    %c0 = arith.constant 0 : index
    %c0_0 = arith.constant 0 : index
    %0 = vector.load %arg1[%c0, %c0_0] : memref<128x16xf32, #tpu.memory_space<vmem>>, vector<128x16xf32>
    %1 = tpu.transpose %0, [1, 0] : vector<128x16xf32> -> vector<16x128xf32>
    %2 = arith.truncf %1 : vector<16x128xf32> to vector<16x128xbf16>
    %c0_1 = arith.constant 0 : index
    %c0_2 = arith.constant 0 : index
    %3 = vector.load %arg2[%c0_1, %c0_2] : memref<56x16xbf16, #tpu.memory_space<vmem>>, vector<56x16xbf16>
    %cst = arith.constant dense<0.000000e+00> : vector<56x128xf32>
    %4 = tpu.matmul %3, %2, %cst {dimension_numbers = #tpu.dot_dimension_numbers<[1], [0], [0], [1], [0, 0, 1, 1], [], []>} : vector<56x16xbf16>, vector<16x128xbf16>, vector<56x128xf32> -> vector<56x128xf32>
    %5 = arith.truncf %4 : vector<56x128xf32> to vector<56x128xbf16>
    %c0_3 = arith.constant 0 : index
    %c0_4 = arith.constant 0 : index
    %6 = vector.load %arg3[%c0_3, %c0_4] : memref<56x1xbf16, #tpu.memory_space<vmem>>, vector<56x1xbf16>
    %7 = vector.broadcast %6 : vector<56x1xbf16> to vector<56x128xbf16>
    %8 = arith.addf %5, %7 : vector<56x128xbf16>
    %cst_5 = arith.constant 0.000000e+00 : bf16
    %9 = vector.broadcast %cst_5 : bf16 to vector<56x128xbf16>
    %10 = arith.maximumf %8, %9 : vector<56x128xbf16>
    %c0_6 = arith.constant 0 : index
    %c0_7 = arith.constant 0 : index
    %11 = vector.load %arg4[%c0_6, %c0_7] : memref<32x56xbf16, #tpu.memory_space<vmem>>, vector<32x56xbf16>
    %cst_8 = arith.constant dense<0.000000e+00> : vector<32x128xf32>
    %12 = tpu.matmul %11, %10, %cst_8 {dimension_numbers = #tpu.dot_dimension_numbers<[1], [0], [0], [1], [0, 0, 1, 1], [], []>} : vector<32x56xbf16>, vector<56x128xbf16>, vector<32x128xf32> -> vector<32x128xf32>
    %13 = arith.truncf %12 : vector<32x128xf32> to vector<32x128xbf16>
    %cst_9 = arith.constant 0.000000e+00 : bf16
    %14 = vector.broadcast %cst_9 : bf16 to vector<32x128xbf16>
    %15 = arith.maximumf %13, %14 : vector<32x128xbf16>
    %c0_10 = arith.constant 0 : index
    %c0_11 = arith.constant 0 : index
    %16 = vector.load %arg5[%c0_10, %c0_11] : memref<1x32xbf16, #tpu.memory_space<vmem>>, vector<1x32xbf16>
    %cst_12 = arith.constant dense<0.000000e+00> : vector<1x128xf32>
    %17 = tpu.matmul %16, %15, %cst_12 {dimension_numbers = #tpu.dot_dimension_numbers<[1], [0], [0], [1], [0, 0, 1, 1], [], []>} : vector<1x32xbf16>, vector<32x128xbf16>, vector<1x128xf32> -> vector<1x128xf32>
    %c0_13 = arith.constant 0 : index
    %c0_14 = arith.constant 0 : index
    %18 = vector.load %arg6[%c0_13, %c0_14] : memref<1x128xf32, #tpu.memory_space<vmem>>, vector<1x128xf32>
    tpu.vector_store %arg6[%c0_13, %c0_14], %17 {strides = array<i32>} : memref<1x128xf32, #tpu.memory_space<vmem>>, vector<1x128xf32>,
    return
  }
  func.func @transform_0(%arg0: i32) -> (i32, i32) {
    %c0_i32 = arith.constant 0 : i32
    %c0_i32_0 = arith.constant 0 : i32
    return %arg0, %c0_i32 : i32, i32
  }
  func.func @transform_1(%arg0: i32) -> (i32, i32) {
    %c0_i32 = arith.constant 0 : i32
    %c0_i32_0 = arith.constant 0 : i32
    %c0_i32_1 = arith.constant 0 : i32
    return %c0_i32, %c0_i32_0 : i32, i32
  }
  func.func @transform_2(%arg0: i32) -> (i32, i32) {
    %c0_i32 = arith.constant 0 : i32
    %c0_i32_0 = arith.constant 0 : i32
    %c0_i32_1 = arith.constant 0 : i32
    return %c0_i32, %c0_i32_0 : i32, i32
  }
  func.func @transform_3(%arg0: i32) -> (i32, i32) {
    %c0_i32 = arith.constant 0 : i32
    %c0_i32_0 = arith.constant 0 : i32
    %c0_i32_1 = arith.constant 0 : i32
    return %c0_i32, %c0_i32_0 : i32, i32
  }
  func.func @transform_4(%arg0: i32) -> (i32, i32) {
    %c0_i32 = arith.constant 0 : i32
    %c0_i32_0 = arith.constant 0 : i32
    %c0_i32_1 = arith.constant 0 : i32
    return %c0_i32, %c0_i32_0 : i32, i32
  }
  func.func @transform_5(%arg0: i32) -> (i32, i32) {
    %c0_i32 = arith.constant 0 : i32
    %c0_i32_0 = arith.constant 0 : i32
    return %c0_i32, %arg0 : i32, i32
  }
}

</mosaic_0001>

<bundles_post_ra>
// kernel: tpu_custom_call.1
= control target key start
LH: loop header
LB: loop body
LE: loop exit
PB: predicated region body
PF: predicated region fallthrough
CT: control target
= control target key end

     0   :  { %s544_s0 = inlined_call_operand.vmem [shape: f32[8,16], index: 0, kind: input, shape index: {}]   ;;  %s545_s1 = inlined_call_operand.vmem [shape: bf16[56,16], index: 1, kind: input, shape index: {}]   ;;  %s546_s2 = inlined_call_operand.vmem [shape: bf16[56,1], index: 2, kind: input, shape index: {}]   ;;  %s547_s3 = inlined_call_operand.vmem [shape: bf16[32,56], index: 3, kind: input, shape index: {}]   ;;  %s548_s4 = inlined_call_operand.vmem [shape: bf16[1,32], index: 4, kind: input, shape index: {}]   ;;  %s549_s5 = inlined_call_operand.hbm [shape: f32[1,128], index: 5, kind: output, shape index: {}]  }
   0x1   :  { %v22_v0 = vld [vmem:[%s544_s0] sm:$0xff] }
   0x2   :  { %38 = vxpose.xlu0.b32.start [1/16] (narrow) %v22_v0, 16 }
   0x3   :  { %10 = vsyncpa [#allocation3], 0  ;;  %v23_v1 = vld [vmem:[%s544_s0 + $0x8] sm:$0xff]  ;;  %v24_v2 = vld [vmem:[%s544_s0 + $0x10] sm:$0xff]  ;;  %v418_v16 = vmov 0   ;;  %vm96_vm0 = vcmask 130048  }
   0x4   :  { %v25_v3 = vld [vmem:[%s544_s0 + $0x18] sm:$0xff]  ;;  %v26_v4 = vld [vmem:[%s544_s0 + $0x20] sm:$0xff]  ;;  %v27_v5 = vld [vmem:[%s544_s0 + $0x28] sm:$0xff]  ;;  %389 = vset.pattern.permute.xlu1 %v418_v16  ;;  %390 = vset.pattern.permute.xlu2 %v418_v16  ;;  %v419_v40 = vmov 839922192   ;;  %vm281_vm1 = vcmask 1043456  }
   0x5   :  { %v28_v6 = vld [vmem:[%s544_s0 + $0x30] sm:$0xff]  ;;  %v29_v7 = vld [vmem:[%s544_s0 + $0x38] sm:$0xff]  ;;  %v30_v8 = vld [vmem:[%s544_s0 + $0x40] sm:$0xff]  ;;  %v157_v41 = vunpack.c.l.s4 %v419_v40  ;;  %vm274_vm2 = vcmask 457728   ;;  %vm319_vm3 = vcmask 261120   ;;  %s344_s28 = sshll.u32 %s549_s5, 4  ;;  %s345_s28 = int_to_ptr.hbm [resolvable:$true] %s344_s28 }
   0x6   :  { %v31_v9 = vld [vmem:[%s544_s0 + $0x48] sm:$0xff]  ;;  %v32_v10 = vld [vmem:[%s544_s0 + $0x50] sm:$0xff]  ;;  %v33_v11 = vld [vmem:[%s544_s0 + $0x58] sm:$0xff] }
   0x7   :  { %v34_v12 = vld [vmem:[%s544_s0 + $0x60] sm:$0xff]  ;;  %v35_v13 = vld [vmem:[%s544_s0 + $0x68] sm:$0xff]  ;;  %v36_v14 = vld [vmem:[%s544_s0 + $0x70] sm:$0xff]  ;;  %v158_v45 = vunpack.c.0.s8 %v157_v41 }
   0x8   :  { %v37_v15 = vld [vmem:[%s544_s0 + $0x78] sm:$0xff]  ;;  %v148_v18 = vld [vmem:[%s546_s2 + $0x10] sm:$0xf]  ;;  %v147_v19 = vld [vmem:[%s546_s2 + $0xc] sm:$0xf] }
   0x9   :  { %v150_v17 = vld [vmem:[%s546_s2 + $0x18] sm:$0xf]  ;;  %v145_v20 = vld [vmem:[%s546_s2 + $0x4] sm:$0xf]  ;;  %v149_v21 = vld [vmem:[%s546_s2 + $0x14] sm:$0xf] }
   0xa   :  { %39 = vxpose.xlu0.b32.cont [2/16] (narrow) %v23_v1, 16  ;;  %207 = vperm.xlu1 %389, %v150_v17   ;;  %v146_v23 = vld [vmem:[%s546_s2 + $0x8] sm:$0xf]  ;;  %v380_v26 = vld [vmem:[%s545_s1] sm:$0xff]  ;;  %v382_v27 = vld [vmem:[%s545_s1 + $0x10] sm:$0xff] }
   0xb   :  { %198 = vperm.xlu2 %390, %v149_v21   ;;  %v144_v28 = vld [vmem:[%s546_s2] sm:$0xf]  ;;  %v77_v29 = vld [vmem:[%s545_s1 + $0x18] sm:$0xf]  ;;  %v381_v31 = vld [vmem:[%s545_s1 + $0x8] sm:$0xff] }
   0xc   :  { %v91_v30 = vunpack.c.l.b16 %v77_v29 }
   0xe   :  { %v95_v32 = vpack.c.b16 %v91_v30, %v91_v30 }
  0x12   :  { %40 = vxpose.xlu0.b32.cont [3/16] (narrow) %v24_v2, 16  ;;  %189 = vperm.xlu1 %389, %v148_v18  }
  0x13   :  { %171 = vperm.xlu2 %390, %v146_v23  }
  0x1a   :  { %41 = vxpose.xlu0.b32.cont [4/16] (narrow) %v25_v3, 16  ;;  %180 = vperm.xlu1 %389, %v147_v19  }
  0x1b   :  { %153 = vperm.xlu2 %390, %v144_v28  }
  0x22   :  { %42 = vxpose.xlu0.b32.cont [5/16] (narrow) %v26_v4, 16  ;;  %162 = vperm.xlu1 %389, %v145_v20  }
  0x2a   :  { %43 = vxpose.xlu0.b32.cont [6/16] (narrow) %v27_v5, 16 }
  0x32   :  { %44 = vxpose.xlu0.b32.cont [7/16] (narrow) %v28_v6, 16 }
  0x3a   :  { %45 = vxpose.xlu0.b32.cont [8/16] (narrow) %v29_v7, 16 }
  0x42   :  { %46 = vxpose.xlu0.b32.cont [9/16] (narrow) %v30_v8, 16 }
  0x4a   :  { %47 = vxpose.xlu0.b32.cont [10/16] (narrow) %v31_v9, 16 }
  0x52   :  { %48 = vxpose.xlu0.b32.cont [11/16] (narrow) %v32_v10, 16 }
  0x5a   :  { %49 = vxpose.xlu0.b32.cont [12/16] (narrow) %v33_v11, 16 }
  0x62   :  { %50 = vxpose.xlu0.b32.cont [13/16] (narrow) %v34_v12, 16 }
  0x65   :  { %v199_v35 = vpop.permute.xlu2 %198 }
  0x66   :  { %v204_v46 = vperm.slane %v199_v35, %v158_v45  ;;  %v384_v35 = vld [vmem:[%s547_s3 + $0x8] sm:$0xff] }
  0x68   :  { %v226_v54 = vunpack.c.l.bf16 %v204_v46  ;;  %v318_v46 = vld [vmem:[%s548_s4] sm:$0x1] }
  0x6a   :  { %51 = vxpose.xlu0.b32.cont [14/16] (narrow) %v35_v13, 16 }
  0x6d   :  { %v172_v39 = vpop.permute.xlu2 %171 }
  0x6e   :  { %v177_v59 = vperm.slane %v172_v39, %v158_v45 }
  0x70   :  { %v223_v9 = vunpack.c.l.bf16 %v177_v59 }
  0x72   :  { %52 = vxpose.xlu0.b32.cont [15/16] (narrow) %v36_v14, 16 }
  0x75   :  { %v154_v52 = vpop.permute.xlu2 %153 }
  0x76   :  { %v159_v2 = vperm.slane %v154_v52, %v158_v45 }
  0x7a   :  { %53 = vxpose.xlu0.b32.end [16/16] (narrow) %v37_v15, 16  ;;  %v221_v15 = vunpack.c.l.bf16 %v159_v2 }
  0x7c   :  { %v208_v33 = vpop.permute.xlu1 %207 }
  0x7d   :  { %v213_v48 = vperm.slane %v208_v33, %v158_v45 }
  0x7f   :  { %v227_v58 = vunpack.c.l.bf16 %v213_v48 }
  0x84   :  { %v190_v36 = vpop.permute.xlu1 %189 }
  0x85   :  { %v195_v49 = vperm.slane %v190_v36, %v158_v45 }
  0x87   :  { %v225_v62 = vunpack.c.l.bf16 %v195_v49 }
  0x8c   :  { %v181_v42 = vpop.permute.xlu1 %180 }
  0x8d   :  { %v186_v63 = vperm.slane %v181_v42, %v158_v45 }
  0x8f   :  { %v224_v11 = vunpack.c.l.bf16 %v186_v63 }
  0x94   :  { %v163_v55 = vpop.permute.xlu1 %162 }
  0x95   :  { %v168_v3 = vperm.slane %v163_v55, %v158_v45 }
  0xa6   :  { %v54_v22 = vpop.trf.xlu0 }
  0xae   :  { %v55_v24 = vpop.trf.xlu0 }
  0xaf   :  { %v70_v25 = vpack.c.bf16 %v55_v24, %v54_v22 }
  0xb1   :  { %116 = vmatpush.bf16.msra.mxu0 %v70_v25  ;;  %385 = vmatpush.bf16.msra.mxu3 %v70_v25 }
  0xb4   :  { %365 = vmatmul.msk.bf16.vlgmr.msra.gmra.mxu0 %vm96_vm0, %v380_v26  ;;  %367 = vmatmul.msk.bf16.vlgmr.msra.gmra.mxu3 %vm96_vm0, %v382_v27 }
  0xc4   :  { %366 = vmatmul.msk.bf16.gmra.mxu0 %vm96_vm0, %v381_v31  ;;  %368 = vmatmul.msk.bf16.gmra.mxu3 %vm96_vm0, %v95_v32 }
  0xe1   :  { %391 = vset.pattern.permute.xlu0 %v418_v16  ;;  %v222_v16 = vunpack.c.l.bf16 %v168_v3 }
 0x131   :  { %v118_v34 = vpop.f32.mrf.mxu0 }
 0x132   :  { %v137_v5 = vpack.c.bf16 %v118_v34, %v118_v34  ;;  %v383_v34 = vld [vmem:[%s547_s3] sm:$0xff]  ;;  %s420_s3 = smov [#allocation2]  }
 0x133   :  { %s342_s25 = sshll.u32 %s420_s3, 4  ;;  %s343_s25 = int_to_ptr.vmem [resolvable:$true] %s342_s25 }
 0x134   :  { %v214_v18 = vunpack.c.l.bf16 %v137_v5 }
 0x136   :  { %v228_v25 = vadd.f32 %v221_v15, %v214_v18 }
 0x137   :  { %v128_v37 = vpop.f32.mrf.mxu3 }
 0x138   :  { %v141_v50 = vpack.c.bf16 %v128_v37, %v128_v37  ;;  %v249_v31 = vmax.f32 %v228_v25, 0.0 }
 0x139   :  { %v120_v38 = vpop.f32.mrf.mxu0 }
 0x13a   :  { %v218_v0 = vunpack.c.l.bf16 %v141_v50  ;;  %v138_v6 = vpack.c.bf16 %v120_v38, %v120_v38 }
 0x13c   :  { %v232_v12 = vadd.f32 %v225_v62, %v218_v0  ;;  %v215_v19 = vunpack.c.l.bf16 %v138_v6 }
 0x13e   :  { %v253_v24 = vmax.f32 %v232_v12, 0.0  ;;  %v229_v26 = vadd.f32 %v222_v16, %v215_v19 }
 0x13f   :  { %v130_v43 = vpop.f32.mrf.mxu3 }
 0x140   :  { %v142_v47 = vpack.c.bf16 %v130_v43, %v130_v43  ;;  %v250_v32 = vmax.f32 %v229_v26, 0.0 }
 0x141   :  { %v123_v44 = vpop.f32.mrf.mxu0 }
 0x142   :  { %v219_v56 = vunpack.c.l.bf16 %v142_v47  ;;  %v139_v1 = vpack.c.bf16 %v123_v44, %v123_v44  ;;  %v256_v33 = vpack.c.bf16 %v250_v32, %v249_v31 }
 0x144   :  { %v233_v7 = vadd.f32 %v226_v54, %v219_v56  ;;  %v216_v13 = vunpack.c.l.bf16 %v139_v1 }
 0x146   :  { %v254_v21 = vmax.f32 %v233_v7, 0.0  ;;  %v230_v23 = vadd.f32 %v223_v9, %v216_v13 }
 0x147   :  { %v133_v51 = vpop.f32.mrf.mxu3 }
 0x148   :  { %v143_v53 = vpack.c.bf16 %v133_v51, %v133_v51  ;;  %v258_v28 = vpack.c.bf16 %v254_v21, %v253_v24  ;;  %v251_v29 = vmax.f32 %v230_v23, 0.0 }
 0x149   :  { %v125_v57 = vpop.f32.mrf.mxu0 }
 0x14a   :  { %v220_v60 = vunpack.c.l.bf16 %v143_v53  ;;  %v140_v61 = vpack.c.bf16 %v125_v57, %v125_v57 }
 0x14c   :  { %v234_v4 = vadd.f32 %v227_v58, %v220_v60  ;;  %v217_v8 = vunpack.c.l.bf16 %v140_v61 }
 0x14e   :  { %v255_v10 = vmax.f32 %v234_v4, 0.0  ;;  %v231_v20 = vadd.f32 %v224_v11, %v217_v8 }
 0x14f   :  { %v135_v14 = vpop.f32.mrf.mxu3 }
 0x150   :  { %v259_v17 = vpack.c.bf16 %v255_v10, %v255_v10  ;;  %v252_v27 = vmax.f32 %v231_v20, 0.0 }
 0x152   :  { %v283_v22 = vsel %vm281_vm1, %v259_v17, 0  ;;  %v257_v30 = vpack.c.bf16 %v252_v27, %v251_v29 }
 0x153   :  { %289 = vmatpush.bf16.msra.mxu1 %v283_v22 }
 0x157   :  { %290 = vmatpush.bf16.msra.mxu1 %v258_v28 }
 0x15b   :  { %291 = vmatpush.bf16.msra.mxu1 %v257_v30 }
 0x15f   :  { %292 = vmatpush.bf16.msra.mxu1 %v256_v33 }
 0x162   :  { %377 = vmatmul.msk.bf16.vlgmr.msra.gmra.mxu1 %vm274_vm2, %v383_v34 }
 0x172   :  { %378 = vmatmul.msk.bf16.gmra.mxu1 %vm274_vm2, %v384_v35 }
 0x1df   :  { %v294_v36 = vpop.f32.mrf.mxu1 }
 0x1e0   :  { %v312_v44 = vmax.f32 %v294_v36, 0.0 }
 0x1e7   :  { %v296_v37 = vpop.f32.mrf.mxu1 }
 0x1e8   :  { %v313_v42 = vmax.f32 %v296_v37, 0.0 }
 0x1ea   :  { %v316_v45 = vpack.c.bf16 %v313_v42, %v312_v44 }
 0x1ef   :  { %v299_v38 = vpop.f32.mrf.mxu1 }
 0x1f0   :  { %v314_v40 = vmax.f32 %v299_v38, 0.0 }
 0x1f7   :  { %v301_v39 = vpop.f32.mrf.mxu1 }
 0x1f8   :  { %v315_v41 = vmax.f32 %v301_v39, 0.0 }
 0x1fa   :  { %v317_v43 = vpack.c.bf16 %v315_v41, %v314_v40 }
 0x1fc   :  { %329 = vmatpush.bf16.msra.mxu2 %v317_v43 }
 0x200   :  { %330 = vmatpush.bf16.msra.mxu2 %v316_v45 }
 0x203   :  { %379 = vmatmul.msk.bf16.vlgmr.msra.gmra.mxu2 %vm319_vm3, %v318_v46 }
 0x286   :  { %v332_v47 = vpop.f32.mrf.mxu2 }
 0x287   :  { %336 = vst [vmem:[#allocation2] sm:$0x1] %v332_v47 }
 0x288   :  { %347 = dma.vmem_to_hbm [thread:$0]  %s343_s25, 16, %s345_s28, [#allocation3]  }
 0x28e   :  { %v334_v48 = vpop.f32.mrf.mxu2 }
 0x28f   :  { %416 = dma.done.wait [#allocation3], 16  }
 0x290   :  { %417 = vsyncadd [#allocation3], 4294967280 }
 0x291   :  { %352 = vsyncpa [#allocation3], 1 }

</bundles_post_ra>
